<compile_context>
chip_gen: v5e
topology: v5e:2x2
jax: 0.10.0
libtpu: 0.0.40
codegen_flags: <defaults>
</compile_context>

<pallas_src>
import functools

import numpy as np

import jax
import jax.numpy as jnp
from jax import lax
from jax.experimental import pallas as pl
from jax.experimental.pallas import tpu as pltpu


def _upsample_conv_kernel(x_ref, p_ref, we0_ref, we1_ref, wo0_ref, wo1_ref, b_ref,
                          o_ref, *, TH, W, row_axis):
    """One (batch, output-row-tile) step of nearest-2x upsample + 3x3 'same' conv.

    x_ref   : (1, H0, C_in, W0)   raw input image, row-leading layout
    p_ref   : (W0, 3*W)           fused 0/1 {upsample-W, pad, kw-shift} matrix
    we*_ref : (C_out, 3*C_in)     folded weights, even output rows (kh=0 | kh=1+2)
    wo*_ref : (C_out, 3*C_in)     folded weights, odd output rows  (kh=0+1 | kh=2)
    b_ref   : (C_out, 1)          bias (f32)
    o_ref   : (1, C_out, TH*W)    flat, lane-dense output row tile
    """
    _, H0, C_in, W0 = x_ref.shape
    TH0 = TH // 2                    # input rows covered by this output tile
    R = TH0 + 2                      # + 2 halo rows
    dt = x_ref.dtype

    r = pl.program_id(row_axis)
    n_r = pl.num_programs(row_axis)
    r0 = pl.multiple_of(r * TH0, TH0)    # first input row of this tile

    # ---- halo gather: stack row i <-> input row r0-1+i (zeroed outside the image) ----
    # Row selection is on the leading (slab) axis -> no sublane-offset relayouts.
    top = x_ref[0, pl.ds(jnp.maximum(r0 - 1, 0), 1), :, :] * (r > 0).astype(dt)
    core = x_ref[0, pl.ds(r0, TH0), :, :]
    bot = x_ref[0, pl.ds(jnp.minimum(r0 + TH0, H0 - 1), 1), :, :] * (r < n_r - 1).astype(dt)
    rows = jnp.concatenate([top, core, bot], axis=0)                  # (R, C_in, W0)

    # ---- fused nearest-2x W-upsample + zero pad + kw-tap shift: ONE 0/1 matmul ----
    up = jnp.dot(rows.reshape(R * C_in, W0), p_ref[...],
                 preferred_element_type=jnp.float32)                  # (R*C_in, 3*W)
    up = up.astype(dt).reshape(R, C_in, 3 * W)                        # exact (0/1 select)

    # regroup kw taps onto the contraction (sublane) axis, (row, W) onto the lane axis
    ucat = jnp.concatenate([up[:, :, k * W:(k + 1) * W] for k in range(3)],
                           axis=1)                                     # (R, 3*C_in, W)
    flat = jnp.concatenate([ucat[i] for i in range(R)], axis=-1)       # (3*C_in, R*W)
    f0 = flat[:, 0:TH0 * W]               # lane block s -> stack row s
    f1 = flat[:, W:(TH0 + 1) * W]         # lane block s -> stack row s+1
    f2 = flat[:, 2 * W:(TH0 + 2) * W]     # lane block s -> stack row s+2

    # ---- 3x3 conv: 4 lane-dense matmuls, M=C_out, K=3*C_in, N=TH0*W ----
    b = b_ref[...]
    even = jnp.dot(we0_ref[...], f0, preferred_element_type=jnp.float32)
    even = even + jnp.dot(we1_ref[...], f1, preferred_element_type=jnp.float32) + b
    odd = jnp.dot(wo0_ref[...], f1, preferred_element_type=jnp.float32)
    odd = odd + jnp.dot(wo1_ref[...], f2, preferred_element_type=jnp.float32) + b
    even = even.astype(o_ref.dtype)                                    # (C_out, TH0*W)
    odd = odd.astype(o_ref.dtype)

    # ---- interleave even/odd output rows into the flat lane-dense output block ----
    for s in range(TH0):
        o_ref[0, :, (2 * s) * W:(2 * s + 1) * W] = even[:, s * W:(s + 1) * W]
        o_ref[0, :, (2 * s + 1) * W:(2 * s + 2) * W] = odd[:, s * W:(s + 1) * W]


def upsample_forward(x_nchw, weight_oihw, bias):
    """Equivalent of Upsample(channels, use_conv=True, dims=2).forward(x).

    x_nchw      : (N, C_in, H0, W0)   float32
    weight_oihw : (C_out, C_in, 3, 3) float32 (PyTorch Conv2d layout)
    bias        : (C_out,)            float32
    returns     : (N, C_out, 2*H0, 2*W0) float32 (NCHW, like PyTorch)
    """
    N, C_in, H0, W0 = x_nchw.shape
    C_out = weight_oihw.shape[0]
    H, W = 2 * H0, 2 * W0

    # output rows per grid step (v6e with 128 MiB VMEM can go to 32; 16 is v7x-safe)
    TH = H
    for cand in (16, 8, 4, 2):
        if H % cand == 0:
            TH = cand
            break
    if (TH * W) % 128 != 0 and TH != H:
        TH = H                       # full-extent block is always layout-legal
    TH0 = TH // 2
    n_r = H // TH
    R = TH0 + 2

    cdt = jnp.bfloat16               # bf16 operands, f32 accumulation in the kernel

    # input: NCHW -> (N, H0, C_in, W0); only the (small) raw input is transposed once,
    # so halo rows are leading-axis slices inside the kernel (no in-kernel relayouts).
    x_t = jnp.transpose(x_nchw, (0, 2, 1, 3)).astype(cdt)

    # ---- one-time parameter folding (would live in module init in a real model) ----
    # wk[kh][co, kw*C_in + ci] = weight[co, ci, kh, kw]
    wk = [jnp.transpose(weight_oihw[:, :, kh, :], (0, 2, 1)).reshape(C_out, 3 * C_in)
          for kh in range(3)]
    w_e0 = wk[0].astype(cdt)                # even rows: kh=0   -> input row s-1
    w_e1 = (wk[1] + wk[2]).astype(cdt)      # even rows: kh=1,2 -> input row s
    w_o0 = (wk[0] + wk[1]).astype(cdt)      # odd rows:  kh=0,1 -> input row s
    w_o1 = wk[2].astype(cdt)                # odd rows:  kh=2   -> input row s+1
    b2 = bias.reshape(C_out, 1).astype(jnp.float32)

    # Fused 0/1 matrix for {nearest-2x W upsample, zero pad, kw shift}:
    # P_cat[m, kw*W + j] = 1 iff padded upsampled column (j + kw) comes from input col m.
    jcol = np.arange(W)
    msrc = np.arange(W0)
    P = np.zeros((3, W0, W), np.float32)
    for kw in range(3):
        p = jcol + kw
        valid = (p >= 1) & (p <= W)
        src = (p - 1) // 2
        P[kw] = (msrc[:, None] == src[None, :]) & valid[None, :]
    P_cat = jnp.asarray(np.concatenate([P[0], P[1], P[2]], axis=1), dtype=cdt)

    # Grid: lead with the row-tile axis when N == 1 (v7x 2-TensorCore split), otherwise
    # lead with batch so the whole-image input block is fetched once per image.
    if N == 1:
        grid = (n_r, N)
        row_axis = 0
        x_map = lambda r, n: (n, 0, 0, 0)
        o_map = lambda r, n: (n, 0, r)
    else:
        grid = (N, n_r)
        row_axis = 1
        x_map = lambda n, r: (n, 0, 0, 0)
        o_map = lambda n, r: (n, 0, r)

    flops = int(2 * N * C_out * 6 * C_in * H * W            # parity-folded 3x3 conv
                + 2 * N * n_r * R * C_in * W0 * 3 * W)       # fused 0/1 upsample matmul
    bytes_accessed = int(N * C_in * H0 * W0 * 2              # bf16 input
                         + N * C_out * H * W * 4             # f32 output
                         + (4 * C_out * 3 * C_in + W0 * 3 * W) * 2
                         + C_out * 4)

    kernel = functools.partial(_upsample_conv_kernel, TH=TH, W=W, row_axis=row_axis)

    out_flat = pl.pallas_call(
        kernel,
        out_shape=jax.ShapeDtypeStruct((N, C_out, H * W), x_nchw.dtype),
        grid_spec=pltpu.PrefetchScalarGridSpec(
            num_scalar_prefetch=0,
            grid=grid,
            in_specs=[
                # whole raw image per batch element (no HBM-materialized upsampled /
                # padded intermediate); block index constant across a tile-run.
                pl.BlockSpec((1, H0, C_in, W0), x_map),
                # small constants: whole-array VMEM residents
                pl.BlockSpec(memory_space=pltpu.MemorySpace.VMEM),   # P_cat
                pl.BlockSpec(memory_space=pltpu.MemorySpace.VMEM),   # w_e0
                pl.BlockSpec(memory_space=pltpu.MemorySpace.VMEM),   # w_e1
                pl.BlockSpec(memory_space=pltpu.MemorySpace.VMEM),   # w_o0
                pl.BlockSpec(memory_space=pltpu.MemorySpace.VMEM),   # w_o1
                pl.BlockSpec(memory_space=pltpu.MemorySpace.VMEM),   # bias
            ],
            out_specs=pl.BlockSpec((1, C_out, TH * W), o_map),
        ),
        compiler_params=pltpu.CompilerParams(
            dimension_semantics=("parallel", "parallel"),
            vmem_limit_bytes=48 * 1024 * 1024),
        cost_estimate=pl.CostEstimate(flops=flops, transcendentals=0,
                                      bytes_accessed=bytes_accessed),
    )(x_t, P_cat, w_e0, w_e1, w_o0, w_o1, b2)

    # free HBM view back to NCHW
    return out_flat.reshape(N, C_out, H, W)


def _reference_forward(x_nchw, weight_oihw, bias):
    """Pure-JAX f32 reference (XLA conv) for correctness checking."""
    x = jnp.repeat(jnp.repeat(x_nchw, 2, axis=2), 2, axis=3)       # nearest 2x in NCHW
    y = lax.conv_general_dilated(
        x, weight_oihw,
        window_strides=(1, 1),
        padding=((1, 1), (1, 1)),
        dimension_numbers=("NCHW", "OIHW", "NCHW"),
        precision=lax.Precision.HIGHEST)
    return y + bias.reshape(1, -1, 1, 1)


if __name__ == "__main__":
    # Module config: Upsample(channels=4, use_conv=True, dims=2, out_channels=8)
    channels = 4
    out_channels = 8
    N, H0, W0 = 2, 16, 16

    key = jax.random.PRNGKey(0)
    kx, kwt, kb = jax.random.split(key, 3)

    x = jax.random.normal(kx, (N, channels, H0, W0), dtype=jnp.float32)
    fan_in = channels * 3 * 3
    bound = 1.0 / np.sqrt(fan_in)
    weight = jax.random.uniform(kwt, (out_channels, channels, 3, 3),
                                minval=-bound, maxval=bound, dtype=jnp.float32)
    bias = jax.random.uniform(kb, (out_channels,),
                              minval=-bound, maxval=bound, dtype=jnp.float32)

    out = jax.block_until_ready(jax.jit(upsample_forward)(x, weight, bias))
    ref = jax.block_until_ready(_reference_forward(x, weight, bias))

    assert out.shape == (N, out_channels, 2 * H0, 2 * W0), out.shape
    # bf16 activations/weights with f32 accumulation -> relaxed tolerance vs f32 ref.
    np.testing.assert_allclose(np.asarray(out), np.asarray(ref),
                               rtol=3e-2, atol=3e-2)
    print("KERNEL_OK")
</pallas_src>

<mosaic_0001>
module attributes {stable_mosaic.version = 11 : i64} {
  func.func @_upsample_conv_kernel(%arg0: i32, %arg1: i32, %arg2: memref<1x16x4x16xbf16, #tpu.memory_space<vmem>>, %arg3: memref<16x96xbf16, #tpu.memory_space<vmem>>, %arg4: memref<8x12xbf16, #tpu.memory_space<vmem>>, %arg5: memref<8x12xbf16, #tpu.memory_space<vmem>>, %arg6: memref<8x12xbf16, #tpu.memory_space<vmem>>, %arg7: memref<8x12xbf16, #tpu.memory_space<vmem>>, %arg8: memref<8x1xf32, #tpu.memory_space<vmem>>, %arg9: memref<1x8x512xf32, #tpu.memory_space<vmem>>) attributes {dimension_semantics = [#tpu.dimension_semantics<parallel>, #tpu.dimension_semantics<parallel>], iteration_bounds = array<i64: 2, 2>, scalar_prefetch = 0 : i64, scratch_operands = 0 : i64, tpu.core_type = #tpu.core_type<tc>, window_params = [{transform_indices = @transform_0, window_bounds = array<i64: 1, 16, 4, 16>}, {pipeline_mode = #tpu.pipeline_mode<synchronous>, transform_indices = @transform_1, window_bounds = array<i64: 16, 96>}, {pipeline_mode = #tpu.pipeline_mode<synchronous>, transform_indices = @transform_2, window_bounds = array<i64: 8, 12>}, {pipeline_mode = #tpu.pipeline_mode<synchronous>, transform_indices = @transform_3, window_bounds = array<i64: 8, 12>}, {pipeline_mode = #tpu.pipeline_mode<synchronous>, transform_indices = @transform_4, window_bounds = array<i64: 8, 12>}, {pipeline_mode = #tpu.pipeline_mode<synchronous>, transform_indices = @transform_5, window_bounds = array<i64: 8, 12>}, {pipeline_mode = #tpu.pipeline_mode<synchronous>, transform_indices = @transform_6, window_bounds = array<i64: 8, 1>}, {transform_indices = @transform_7, window_bounds = array<i64: 1, 8, 512>}]} {
    %c8_i32 = arith.constant 8 : i32
    %0 = arith.muli %arg1, %c8_i32 : i32
    %1 = tpu.assume_multiple %0, 8 : i32
    %c1_i32 = arith.constant 1 : i32
    %2 = arith.subi %1, %c1_i32 : i32
    %c0_i32 = arith.constant 0 : i32
    %3 = arith.maxsi %2, %c0_i32 : i32
    %c0 = arith.constant 0 : index
    %4 = arith.index_cast %3 : i32 to index
    %c0_0 = arith.constant 0 : index
    %c0_1 = arith.constant 0 : index
    %5 = vector.load %arg2[%c0, %4, %c0_0, %c0_1] : memref<1x16x4x16xbf16, #tpu.memory_space<vmem>>, vector<1x1x4x16xbf16>
    %6 = vector.shape_cast %5 : vector<1x1x4x16xbf16> to vector<1x4x16xbf16>
    %c0_i32_2 = arith.constant 0 : i32
    %7 = arith.cmpi sgt, %arg1, %c0_i32_2 : i32
    %8 = arith.extui %7 : i1 to i32
    %9 = arith.sitofp %8 : i32 to f32
    %10 = arith.truncf %9 : f32 to bf16
    %11 = vector.broadcast %10 : bf16 to vector<1x4x16xbf16>
    %12 = arith.mulf %6, %11 : vector<1x4x16xbf16>
    %c0_3 = arith.constant 0 : index
    %13 = arith.index_cast %1 : i32 to index
    %c0_4 = arith.constant 0 : index
    %c0_5 = arith.constant 0 : index
    %14 = vector.load %arg2[%c0_3, %13, %c0_4, %c0_5] : memref<1x16x4x16xbf16, #tpu.memory_space<vmem>>, vector<1x8x4x16xbf16>
    %15 = vector.shape_cast %14 : vector<1x8x4x16xbf16> to vector<8x4x16xbf16>
    %c8_i32_6 = arith.constant 8 : i32
    %16 = arith.addi %1, %c8_i32_6 : i32
    %c15_i32 = arith.constant 15 : i32
    %17 = arith.minsi %16, %c15_i32 : i32
    %c0_7 = arith.constant 0 : index
    %18 = arith.index_cast %17 : i32 to index
    %c0_8 = arith.constant 0 : index
    %c0_9 = arith.constant 0 : index
    %19 = vector.load %arg2[%c0_7, %18, %c0_8, %c0_9] : memref<1x16x4x16xbf16, #tpu.memory_space<vmem>>, vector<1x1x4x16xbf16>
    %20 = vector.shape_cast %19 : vector<1x1x4x16xbf16> to vector<1x4x16xbf16>
    %c1_i32_10 = arith.constant 1 : i32
    %21 = arith.cmpi slt, %arg1, %c1_i32_10 : i32
    %22 = arith.extui %21 : i1 to i32
    %23 = arith.sitofp %22 : i32 to f32
    %24 = arith.truncf %23 : f32 to bf16
    %25 = vector.broadcast %24 : bf16 to vector<1x4x16xbf16>
    %26 = arith.mulf %20, %25 : vector<1x4x16xbf16>
    %27 = tpu.concatenate %12, %15, %26 in 0 : vector<1x4x16xbf16>, vector<8x4x16xbf16>, vector<1x4x16xbf16> -> vector<10x4x16xbf16>
    %28 = vector.shape_cast %27 : vector<10x4x16xbf16> to vector<40x16xbf16>
    %c0_11 = arith.constant 0 : index
    %c0_12 = arith.constant 0 : index
    %29 = vector.load %arg3[%c0_11, %c0_12] : memref<16x96xbf16, #tpu.memory_space<vmem>>, vector<16x96xbf16>
    %cst = arith.constant dense<0.000000e+00> : vector<40x96xf32>
    %30 = tpu.matmul %28, %29, %cst {dimension_numbers = #tpu.dot_dimension_numbers<[1], [0], [0], [1], [0, 0, 1, 1], [], []>} : vector<40x16xbf16>, vector<16x96xbf16>, vector<40x96xf32> -> vector<40x96xf32>
    %31 = arith.truncf %30 : vector<40x96xf32> to vector<40x96xbf16>
    %32 = vector.shape_cast %31 : vector<40x96xbf16> to vector<10x4x96xbf16>
    %33 = vector.extract_strided_slice %32 {offsets = [0, 0, 0], sizes = [10, 4, 32], strides = [1, 1, 1]} : vector<10x4x96xbf16> to vector<10x4x32xbf16>
    %34 = vector.extract_strided_slice %32 {offsets = [0, 0, 32], sizes = [10, 4, 32], strides = [1, 1, 1]} : vector<10x4x96xbf16> to vector<10x4x32xbf16>
    %35 = vector.extract_strided_slice %32 {offsets = [0, 0, 64], sizes = [10, 4, 32], strides = [1, 1, 1]} : vector<10x4x96xbf16> to vector<10x4x32xbf16>
    %36 = tpu.concatenate %33, %34, %35 in 1 : vector<10x4x32xbf16>, vector<10x4x32xbf16>, vector<10x4x32xbf16> -> vector<10x12x32xbf16>
    %37 = vector.extract_strided_slice %36 {offsets = [0, 0, 0], sizes = [1, 12, 32], strides = [1, 1, 1]} : vector<10x12x32xbf16> to vector<1x12x32xbf16>
    %38 = vector.shape_cast %37 : vector<1x12x32xbf16> to vector<12x32xbf16>
    %39 = vector.extract_strided_slice %36 {offsets = [1, 0, 0], sizes = [1, 12, 32], strides = [1, 1, 1]} : vector<10x12x32xbf16> to vector<1x12x32xbf16>
    %40 = vector.shape_cast %39 : vector<1x12x32xbf16> to vector<12x32xbf16>
    %41 = vector.extract_strided_slice %36 {offsets = [2, 0, 0], sizes = [1, 12, 32], strides = [1, 1, 1]} : vector<10x12x32xbf16> to vector<1x12x32xbf16>
    %42 = vector.shape_cast %41 : vector<1x12x32xbf16> to vector<12x32xbf16>
    %43 = vector.extract_strided_slice %36 {offsets = [3, 0, 0], sizes = [1, 12, 32], strides = [1, 1, 1]} : vector<10x12x32xbf16> to vector<1x12x32xbf16>
    %44 = vector.shape_cast %43 : vector<1x12x32xbf16> to vector<12x32xbf16>
    %45 = vector.extract_strided_slice %36 {offsets = [4, 0, 0], sizes = [1, 12, 32], strides = [1, 1, 1]} : vector<10x12x32xbf16> to vector<1x12x32xbf16>
    %46 = vector.shape_cast %45 : vector<1x12x32xbf16> to vector<12x32xbf16>
    %47 = vector.extract_strided_slice %36 {offsets = [5, 0, 0], sizes = [1, 12, 32], strides = [1, 1, 1]} : vector<10x12x32xbf16> to vector<1x12x32xbf16>
    %48 = vector.shape_cast %47 : vector<1x12x32xbf16> to vector<12x32xbf16>
    %49 = vector.extract_strided_slice %36 {offsets = [6, 0, 0], sizes = [1, 12, 32], strides = [1, 1, 1]} : vector<10x12x32xbf16> to vector<1x12x32xbf16>
    %50 = vector.shape_cast %49 : vector<1x12x32xbf16> to vector<12x32xbf16>
    %51 = vector.extract_strided_slice %36 {offsets = [7, 0, 0], sizes = [1, 12, 32], strides = [1, 1, 1]} : vector<10x12x32xbf16> to vector<1x12x32xbf16>
    %52 = vector.shape_cast %51 : vector<1x12x32xbf16> to vector<12x32xbf16>
    %53 = vector.extract_strided_slice %36 {offsets = [8, 0, 0], sizes = [1, 12, 32], strides = [1, 1, 1]} : vector<10x12x32xbf16> to vector<1x12x32xbf16>
    %54 = vector.shape_cast %53 : vector<1x12x32xbf16> to vector<12x32xbf16>
    %55 = vector.extract_strided_slice %36 {offsets = [9, 0, 0], sizes = [1, 12, 32], strides = [1, 1, 1]} : vector<10x12x32xbf16> to vector<1x12x32xbf16>
    %56 = vector.shape_cast %55 : vector<1x12x32xbf16> to vector<12x32xbf16>
    %57 = tpu.concatenate %38, %40, %42, %44, %46, %48, %50, %52, %54, %56 in 1 : vector<12x32xbf16>, vector<12x32xbf16>, vector<12x32xbf16>, vector<12x32xbf16>, vector<12x32xbf16>, vector<12x32xbf16>, vector<12x32xbf16>, vector<12x32xbf16>, vector<12x32xbf16>, vector<12x32xbf16> -> vector<12x320xbf16>
    %58 = vector.extract_strided_slice %57 {offsets = [0, 0], sizes = [12, 256], strides = [1, 1]} : vector<12x320xbf16> to vector<12x256xbf16>
    %59 = vector.extract_strided_slice %57 {offsets = [0, 32], sizes = [12, 256], strides = [1, 1]} : vector<12x320xbf16> to vector<12x256xbf16>
    %60 = vector.extract_strided_slice %57 {offsets = [0, 64], sizes = [12, 256], strides = [1, 1]} : vector<12x320xbf16> to vector<12x256xbf16>
    %c0_13 = arith.constant 0 : index
    %c0_14 = arith.constant 0 : index
    %61 = vector.load %arg8[%c0_13, %c0_14] : memref<8x1xf32, #tpu.memory_space<vmem>>, vector<8x1xf32>
    %c0_15 = arith.constant 0 : index
    %c0_16 = arith.constant 0 : index
    %62 = vector.load %arg4[%c0_15, %c0_16] : memref<8x12xbf16, #tpu.memory_space<vmem>>, vector<8x12xbf16>
    %cst_17 = arith.constant dense<0.000000e+00> : vector<8x256xf32>
    %63 = tpu.matmul %62, %58, %cst_17 {dimension_numbers = #tpu.dot_dimension_numbers<[1], [0], [0], [1], [0, 0, 1, 1], [], []>} : vector<8x12xbf16>, vector<12x256xbf16>, vector<8x256xf32> -> vector<8x256xf32>
    %c0_18 = arith.constant 0 : index
    %c0_19 = arith.constant 0 : index
    %64 = vector.load %arg5[%c0_18, %c0_19] : memref<8x12xbf16, #tpu.memory_space<vmem>>, vector<8x12xbf16>
    %cst_20 = arith.constant dense<0.000000e+00> : vector<8x256xf32>
    %65 = tpu.matmul %64, %59, %cst_20 {dimension_numbers = #tpu.dot_dimension_numbers<[1], [0], [0], [1], [0, 0, 1, 1], [], []>} : vector<8x12xbf16>, vector<12x256xbf16>, vector<8x256xf32> -> vector<8x256xf32>
    %66 = arith.addf %63, %65 : vector<8x256xf32>
    %67 = vector.broadcast %61 : vector<8x1xf32> to vector<8x256xf32>
    %68 = arith.addf %66, %67 : vector<8x256xf32>
    %c0_21 = arith.constant 0 : index
    %c0_22 = arith.constant 0 : index
    %69 = vector.load %arg6[%c0_21, %c0_22] : memref<8x12xbf16, #tpu.memory_space<vmem>>, vector<8x12xbf16>
    %cst_23 = arith.constant dense<0.000000e+00> : vector<8x256xf32>
    %70 = tpu.matmul %69, %59, %cst_23 {dimension_numbers = #tpu.dot_dimension_numbers<[1], [0], [0], [1], [0, 0, 1, 1], [], []>} : vector<8x12xbf16>, vector<12x256xbf16>, vector<8x256xf32> -> vector<8x256xf32>
    %c0_24 = arith.constant 0 : index
    %c0_25 = arith.constant 0 : index
    %71 = vector.load %arg7[%c0_24, %c0_25] : memref<8x12xbf16, #tpu.memory_space<vmem>>, vector<8x12xbf16>
    %cst_26 = arith.constant dense<0.000000e+00> : vector<8x256xf32>
    %72 = tpu.matmul %71, %60, %cst_26 {dimension_numbers = #tpu.dot_dimension_numbers<[1], [0], [0], [1], [0, 0, 1, 1], [], []>} : vector<8x12xbf16>, vector<12x256xbf16>, vector<8x256xf32> -> vector<8x256xf32>
    %73 = arith.addf %70, %72 : vector<8x256xf32>
    %74 = vector.broadcast %61 : vector<8x1xf32> to vector<8x256xf32>
    %75 = arith.addf %73, %74 : vector<8x256xf32>
    %76 = vector.extract_strided_slice %68 {offsets = [0, 0], sizes = [8, 32], strides = [1, 1]} : vector<8x256xf32> to vector<8x32xf32>
    %c0_27 = arith.constant 0 : index
    %c0_28 = arith.constant 0 : index
    %c0_29 = arith.constant 0 : index
    %77 = vector.load %arg9[%c0_27, %c0_28, %c0_29] : memref<1x8x512xf32, #tpu.memory_space<vmem>>, vector<1x8x32xf32>
    %78 = vector.shape_cast %77 : vector<1x8x32xf32> to vector<8x32xf32>
    %79 = vector.shape_cast %76 : vector<8x32xf32> to vector<1x8x32xf32>
    tpu.vector_store %arg9[%c0_27, %c0_28, %c0_29], %79 {strides = array<i32>} : memref<1x8x512xf32, #tpu.memory_space<vmem>>, vector<1x8x32xf32>,
    %80 = vector.extract_strided_slice %75 {offsets = [0, 0], sizes = [8, 32], strides = [1, 1]} : vector<8x256xf32> to vector<8x32xf32>
    %c0_30 = arith.constant 0 : index
    %c0_31 = arith.constant 0 : index
    %c32 = arith.constant 32 : index
    %81 = vector.load %arg9[%c0_30, %c0_31, %c32] : memref<1x8x512xf32, #tpu.memory_space<vmem>>, vector<1x8x32xf32>
    %82 = vector.shape_cast %81 : vector<1x8x32xf32> to vector<8x32xf32>
    %83 = vector.shape_cast %80 : vector<8x32xf32> to vector<1x8x32xf32>
    tpu.vector_store %arg9[%c0_30, %c0_31, %c32], %83 {strides = array<i32>} : memref<1x8x512xf32, #tpu.memory_space<vmem>>, vector<1x8x32xf32>,
    %84 = vector.extract_strided_slice %68 {offsets = [0, 32], sizes = [8, 32], strides = [1, 1]} : vector<8x256xf32> to vector<8x32xf32>
    %c0_32 = arith.constant 0 : index
    %c0_33 = arith.constant 0 : index
    %c64 = arith.constant 64 : index
    %85 = vector.load %arg9[%c0_32, %c0_33, %c64] : memref<1x8x512xf32, #tpu.memory_space<vmem>>, vector<1x8x32xf32>
    %86 = vector.shape_cast %85 : vector<1x8x32xf32> to vector<8x32xf32>
    %87 = vector.shape_cast %84 : vector<8x32xf32> to vector<1x8x32xf32>
    tpu.vector_store %arg9[%c0_32, %c0_33, %c64], %87 {strides = array<i32>} : memref<1x8x512xf32, #tpu.memory_space<vmem>>, vector<1x8x32xf32>,
    %88 = vector.extract_strided_slice %75 {offsets = [0, 32], sizes = [8, 32], strides = [1, 1]} : vector<8x256xf32> to vector<8x32xf32>
    %c0_34 = arith.constant 0 : index
    %c0_35 = arith.constant 0 : index
    %c96 = arith.constant 96 : index
    %89 = vector.load %arg9[%c0_34, %c0_35, %c96] : memref<1x8x512xf32, #tpu.memory_space<vmem>>, vector<1x8x32xf32>
    %90 = vector.shape_cast %89 : vector<1x8x32xf32> to vector<8x32xf32>
    %91 = vector.shape_cast %88 : vector<8x32xf32> to vector<1x8x32xf32>
    tpu.vector_store %arg9[%c0_34, %c0_35, %c96], %91 {strides = array<i32>} : memref<1x8x512xf32, #tpu.memory_space<vmem>>, vector<1x8x32xf32>,
    %92 = vector.extract_strided_slice %68 {offsets = [0, 64], sizes = [8, 32], strides = [1, 1]} : vector<8x256xf32> to vector<8x32xf32>
    %c0_36 = arith.constant 0 : index
    %c0_37 = arith.constant 0 : index
    %c128 = arith.constant 128 : index
    %93 = vector.load %arg9[%c0_36, %c0_37, %c128] : memref<1x8x512xf32, #tpu.memory_space<vmem>>, vector<1x8x32xf32>
    %94 = vector.shape_cast %93 : vector<1x8x32xf32> to vector<8x32xf32>
    %95 = vector.shape_cast %92 : vector<8x32xf32> to vector<1x8x32xf32>
    tpu.vector_store %arg9[%c0_36, %c0_37, %c128], %95 {strides = array<i32>} : memref<1x8x512xf32, #tpu.memory_space<vmem>>, vector<1x8x32xf32>,
    %96 = vector.extract_strided_slice %75 {offsets = [0, 64], sizes = [8, 32], strides = [1, 1]} : vector<8x256xf32> to vector<8x32xf32>
    %c0_38 = arith.constant 0 : index
    %c0_39 = arith.constant 0 : index
    %c160 = arith.constant 160 : index
    %97 = vector.load %arg9[%c0_38, %c0_39, %c160] : memref<1x8x512xf32, #tpu.memory_space<vmem>>, vector<1x8x32xf32>
    %98 = vector.shape_cast %97 : vector<1x8x32xf32> to vector<8x32xf32>
    %99 = vector.shape_cast %96 : vector<8x32xf32> to vector<1x8x32xf32>
    tpu.vector_store %arg9[%c0_38, %c0_39, %c160], %99 {strides = array<i32>} : memref<1x8x512xf32, #tpu.memory_space<vmem>>, vector<1x8x32xf32>,
    %100 = vector.extract_strided_slice %68 {offsets = [0, 96], sizes = [8, 32], strides = [1, 1]} : vector<8x256xf32> to vector<8x32xf32>
    %c0_40 = arith.constant 0 : index
    %c0_41 = arith.constant 0 : index
    %c192 = arith.constant 192 : index
    %101 = vector.load %arg9[%c0_40, %c0_41, %c192] : memref<1x8x512xf32, #tpu.memory_space<vmem>>, vector<1x8x32xf32>
    %102 = vector.shape_cast %101 : vector<1x8x32xf32> to vector<8x32xf32>
    %103 = vector.shape_cast %100 : vector<8x32xf32> to vector<1x8x32xf32>
    tpu.vector_store %arg9[%c0_40, %c0_41, %c192], %103 {strides = array<i32>} : memref<1x8x512xf32, #tpu.memory_space<vmem>>, vector<1x8x32xf32>,
    %104 = vector.extract_strided_slice %75 {offsets = [0, 96], sizes = [8, 32], strides = [1, 1]} : vector<8x256xf32> to vector<8x32xf32>
    %c0_42 = arith.constant 0 : index
    %c0_43 = arith.constant 0 : index
    %c224 = arith.constant 224 : index
    %105 = vector.load %arg9[%c0_42, %c0_43, %c224] : memref<1x8x512xf32, #tpu.memory_space<vmem>>, vector<1x8x32xf32>
    %106 = vector.shape_cast %105 : vector<1x8x32xf32> to vector<8x32xf32>
    %107 = vector.shape_cast %104 : vector<8x32xf32> to vector<1x8x32xf32>
    tpu.vector_store %arg9[%c0_42, %c0_43, %c224], %107 {strides = array<i32>} : memref<1x8x512xf32, #tpu.memory_space<vmem>>, vector<1x8x32xf32>,
    %108 = vector.extract_strided_slice %68 {offsets = [0, 128], sizes = [8, 32], strides = [1, 1]} : vector<8x256xf32> to vector<8x32xf32>
    %c0_44 = arith.constant 0 : index
    %c0_45 = arith.constant 0 : index
    %c256 = arith.constant 256 : index
    %109 = vector.load %arg9[%c0_44, %c0_45, %c256] : memref<1x8x512xf32, #tpu.memory_space<vmem>>, vector<1x8x32xf32>
    %110 = vector.shape_cast %109 : vector<1x8x32xf32> to vector<8x32xf32>
    %111 = vector.shape_cast %108 : vector<8x32xf32> to vector<1x8x32xf32>
    tpu.vector_store %arg9[%c0_44, %c0_45, %c256], %111 {strides = array<i32>} : memref<1x8x512xf32, #tpu.memory_space<vmem>>, vector<1x8x32xf32>,
    %112 = vector.extract_strided_slice %75 {offsets = [0, 128], sizes = [8, 32], strides = [1, 1]} : vector<8x256xf32> to vector<8x32xf32>
    %c0_46 = arith.constant 0 : index
    %c0_47 = arith.constant 0 : index
    %c288 = arith.constant 288 : index
    %113 = vector.load %arg9[%c0_46, %c0_47, %c288] : memref<1x8x512xf32, #tpu.memory_space<vmem>>, vector<1x8x32xf32>
    %114 = vector.shape_cast %113 : vector<1x8x32xf32> to vector<8x32xf32>
    %115 = vector.shape_cast %112 : vector<8x32xf32> to vector<1x8x32xf32>
    tpu.vector_store %arg9[%c0_46, %c0_47, %c288], %115 {strides = array<i32>} : memref<1x8x512xf32, #tpu.memory_space<vmem>>, vector<1x8x32xf32>,
    %116 = vector.extract_strided_slice %68 {offsets = [0, 160], sizes = [8, 32], strides = [1, 1]} : vector<8x256xf32> to vector<8x32xf32>
    %c0_48 = arith.constant 0 : index
    %c0_49 = arith.constant 0 : index
    %c320 = arith.constant 320 : index
    %117 = vector.load %arg9[%c0_48, %c0_49, %c320] : memref<1x8x512xf32, #tpu.memory_space<vmem>>, vector<1x8x32xf32>
    %118 = vector.shape_cast %117 : vector<1x8x32xf32> to vector<8x32xf32>
    %119 = vector.shape_cast %116 : vector<8x32xf32> to vector<1x8x32xf32>
    tpu.vector_store %arg9[%c0_48, %c0_49, %c320], %119 {strides = array<i32>} : memref<1x8x512xf32, #tpu.memory_space<vmem>>, vector<1x8x32xf32>,
    %120 = vector.extract_strided_slice %75 {offsets = [0, 160], sizes = [8, 32], strides = [1, 1]} : vector<8x256xf32> to vector<8x32xf32>
    %c0_50 = arith.constant 0 : index
    %c0_51 = arith.constant 0 : index
    %c352 = arith.constant 352 : index
    %121 = vector.load %arg9[%c0_50, %c0_51, %c352] : memref<1x8x512xf32, #tpu.memory_space<vmem>>, vector<1x8x32xf32>
    %122 = vector.shape_cast %121 : vector<1x8x32xf32> to vector<8x32xf32>
    %123 = vector.shape_cast %120 : vector<8x32xf32> to vector<1x8x32xf32>
    tpu.vector_store %arg9[%c0_50, %c0_51, %c352], %123 {strides = array<i32>} : memref<1x8x512xf32, #tpu.memory_space<vmem>>, vector<1x8x32xf32>,
    %124 = vector.extract_strided_slice %68 {offsets = [0, 192], sizes = [8, 32], strides = [1, 1]} : vector<8x256xf32> to vector<8x32xf32>
    %c0_52 = arith.constant 0 : index
    %c0_53 = arith.constant 0 : index
    %c384 = arith.constant 384 : index
    %125 = vector.load %arg9[%c0_52, %c0_53, %c384] : memref<1x8x512xf32, #tpu.memory_space<vmem>>, vector<1x8x32xf32>
    %126 = vector.shape_cast %125 : vector<1x8x32xf32> to vector<8x32xf32>
    %127 = vector.shape_cast %124 : vector<8x32xf32> to vector<1x8x32xf32>
    tpu.vector_store %arg9[%c0_52, %c0_53, %c384], %127 {strides = array<i32>} : memref<1x8x512xf32, #tpu.memory_space<vmem>>, vector<1x8x32xf32>,
    %128 = vector.extract_strided_slice %75 {offsets = [0, 192], sizes = [8, 32], strides = [1, 1]} : vector<8x256xf32> to vector<8x32xf32>
    %c0_54 = arith.constant 0 : index
    %c0_55 = arith.constant 0 : index
    %c416 = arith.constant 416 : index
    %129 = vector.load %arg9[%c0_54, %c0_55, %c416] : memref<1x8x512xf32, #tpu.memory_space<vmem>>, vector<1x8x32xf32>
    %130 = vector.shape_cast %129 : vector<1x8x32xf32> to vector<8x32xf32>
    %131 = vector.shape_cast %128 : vector<8x32xf32> to vector<1x8x32xf32>
    tpu.vector_store %arg9[%c0_54, %c0_55, %c416], %131 {strides = array<i32>} : memref<1x8x512xf32, #tpu.memory_space<vmem>>, vector<1x8x32xf32>,
    %132 = vector.extract_strided_slice %68 {offsets = [0, 224], sizes = [8, 32], strides = [1, 1]} : vector<8x256xf32> to vector<8x32xf32>
    %c0_56 = arith.constant 0 : index
    %c0_57 = arith.constant 0 : index
    %c448 = arith.constant 448 : index
    %133 = vector.load %arg9[%c0_56, %c0_57, %c448] : memref<1x8x512xf32, #tpu.memory_space<vmem>>, vector<1x8x32xf32>
    %134 = vector.shape_cast %133 : vector<1x8x32xf32> to vector<8x32xf32>
    %135 = vector.shape_cast %132 : vector<8x32xf32> to vector<1x8x32xf32>
    tpu.vector_store %arg9[%c0_56, %c0_57, %c448], %135 {strides = array<i32>} : memref<1x8x512xf32, #tpu.memory_space<vmem>>, vector<1x8x32xf32>,
    %136 = vector.extract_strided_slice %75 {offsets = [0, 224], sizes = [8, 32], strides = [1, 1]} : vector<8x256xf32> to vector<8x32xf32>
    %c0_58 = arith.constant 0 : index
    %c0_59 = arith.constant 0 : index
    %c480 = arith.constant 480 : index
    %137 = vector.load %arg9[%c0_58, %c0_59, %c480] : memref<1x8x512xf32, #tpu.memory_space<vmem>>, vector<1x8x32xf32>
    %138 = vector.shape_cast %137 : vector<1x8x32xf32> to vector<8x32xf32>
    %139 = vector.shape_cast %136 : vector<8x32xf32> to vector<1x8x32xf32>
    tpu.vector_store %arg9[%c0_58, %c0_59, %c480], %139 {strides = array<i32>} : memref<1x8x512xf32, #tpu.memory_space<vmem>>, vector<1x8x32xf32>,
    return
  }
  func.func @transform_0(%arg0: i32, %arg1: i32) -> (i32, i32, i32, i32) {
    %c0_i32 = arith.constant 0 : i32
    %c0_i32_0 = arith.constant 0 : i32
    %c0_i32_1 = arith.constant 0 : i32
    %c0_i32_2 = arith.constant 0 : i32
    return %arg0, %c0_i32, %c0_i32_0, %c0_i32_1 : i32, i32, i32, i32
  }
  func.func @transform_1(%arg0: i32, %arg1: i32) -> (i32, i32) {
    %c0_i32 = arith.constant 0 : i32
    %c0_i32_0 = arith.constant 0 : i32
    %c0_i32_1 = arith.constant 0 : i32
    return %c0_i32, %c0_i32_0 : i32, i32
  }
  func.func @transform_2(%arg0: i32, %arg1: i32) -> (i32, i32) {
    %c0_i32 = arith.constant 0 : i32
    %c0_i32_0 = arith.constant 0 : i32
    %c0_i32_1 = arith.constant 0 : i32
    return %c0_i32, %c0_i32_0 : i32, i32
  }
  func.func @transform_3(%arg0: i32, %arg1: i32) -> (i32, i32) {
    %c0_i32 = arith.constant 0 : i32
    %c0_i32_0 = arith.constant 0 : i32
    %c0_i32_1 = arith.constant 0 : i32
    return %c0_i32, %c0_i32_0 : i32, i32
  }
  func.func @transform_4(%arg0: i32, %arg1: i32) -> (i32, i32) {
    %c0_i32 = arith.constant 0 : i32
    %c0_i32_0 = arith.constant 0 : i32
    %c0_i32_1 = arith.constant 0 : i32
    return %c0_i32, %c0_i32_0 : i32, i32
  }
  func.func @transform_5(%arg0: i32, %arg1: i32) -> (i32, i32) {
    %c0_i32 = arith.constant 0 : i32
    %c0_i32_0 = arith.constant 0 : i32
    %c0_i32_1 = arith.constant 0 : i32
    return %c0_i32, %c0_i32_0 : i32, i32
  }
  func.func @transform_6(%arg0: i32, %arg1: i32) -> (i32, i32) {
    %c0_i32 = arith.constant 0 : i32
    %c0_i32_0 = arith.constant 0 : i32
    %c0_i32_1 = arith.constant 0 : i32
    return %c0_i32, %c0_i32_0 : i32, i32
  }
  func.func @transform_7(%arg0: i32, %arg1: i32) -> (i32, i32, i32) {
    %c0_i32 = arith.constant 0 : i32
    %c0_i32_0 = arith.constant 0 : i32
    return %arg0, %c0_i32, %arg1 : i32, i32, i32
  }
}

</mosaic_0001>

<bundles_post_ra>
// kernel: upsample_forward.1
= control target key start
LH: loop header
LB: loop body
LE: loop exit
PB: predicated region body
PF: predicated region fallthrough
CT: control target
= control target key end

     0   :  { %s1153_s24 = smov 0   ;;  %s1155_s25 = smov 0   ;;  %s1439_s0 = inlined_call_operand.vmem [shape: bf16[2,16,4,16], index: 0, kind: input, shape index: {}]   ;;  %s1440_s1 = inlined_call_operand.vmem [shape: bf16[16,96], index: 1, kind: input, shape index: {}]   ;;  %s1441_s2 = inlined_call_operand.vmem [shape: bf16[8,12], index: 2, kind: input, shape index: {}]   ;;  %s1442_s3 = inlined_call_operand.vmem [shape: bf16[8,12], index: 3, kind: input, shape index: {}]   ;;  %s1443_s4 = inlined_call_operand.vmem [shape: bf16[8,12], index: 4, kind: input, shape index: {}]   ;;  %s1444_s5 = inlined_call_operand.vmem [shape: bf16[8,12], index: 5, kind: input, shape index: {}]   ;;  %s1445_s6 = inlined_call_operand.vmem [shape: f32[8,1], index: 6, kind: input, shape index: {}]   ;;  %s1446_s7 = inlined_call_operand.vmem [shape: f32[2,8,1024], index: 7, kind: output, shape index: {}]  }
   0x1   :  { %s1157_s26 = smov 0   ;;  %s1159_s27 = smov 0  }
   0x2   :  { %s1161_s28 = smov 0  }
   0x3 LB: > { %s26_s29 = sadd.s32 1, %s1099_s26  ;;  %s29_s30 = sadd.s32 1, %s1103_s27  ;;  %s1107_s28 = sphi %s1161_s28, %s17_s28   ;;  %s1103_s27 = sphi %s1159_s27, %s1450_s27   ;;  %s1099_s26 = sphi %s1157_s26, %s1449_s26   ;;  %s1095_s25 = sphi %s1155_s25, %s1448_s25   ;;  %s1091_s24 = sphi %s1153_s24, %s1447_s24  }
   0x4   : > { %p27_p0 = scmp.ge.s32.totalorder %s26_s29, 2  ;;  %p993_p1 = scmp.ge.s32.totalorder %s1107_s28, 1 }
   0x5   : > { %p251_p2 = scmp.lt.s32.totalorder %s1107_s28, 5 }
   0x6   : > { %s1452_s29 = smov (%p27_p0, %s26_s29), 0  ;;  %s1454_s30 = smov (!%p27_p0, %s29_s30), %s1103_s27 }
   0x7   : > { %p252_p3 = pnand %p993_p1, %p251_p2  ;;  %p31_p4 = scmp.ge.s32.totalorder %s1454_s30, 2 }
   0x8   : > { %p287_p5 = scmp.lt.s32.totalorder (!%p252_p3), %s1095_s25, 1  ;;  %s999_s10 = sshll.u32 (!%p252_p3), %s1091_s24, 3 }
   0x9   : > { %s1456_s30 = smov (%p31_p4, %s1454_s30), 0  ;;  %255 = sbr.rel (%p252_p3) target bundleno = 903 (0x387), region = 48 }
   0xa   : > { %s1000_s11 = sadd.s32 (!%p252_p3), 4294967295, %s999_s10  ;;  %p310_p7 = scmp.gt.s32.totalorder (!%p252_p3), %s1091_s24, 0 }
   0xb   : > { %p305_p6 = scmp.gt.s32.totalorder (!%p252_p3), %s1000_s11, 0  ;;  %s1022_s16 = sshll.u32 (!%p252_p3), %s1091_s24, 4 }
   0xc   : > { %s341_s20 = sadd.s32 (!%p252_p3), 8, %s999_s10  ;;  %p347_p10 = scmp.lt.s32.totalorder (!%p252_p3), %s1091_s24, 1 }
   0xd   : > { %p342_p9 = scmp.lt.s32.totalorder (!%p252_p3), %s341_s20, 15 }
   0xe   : > { %v1023_v0 = vld [vmem:[%s1440_s1] sm:$0xff]  ;;  %s1458_s25 = smov (!%p287_p5, %s1095_s25), 1  ;;  %s1460_s11 = smov (!%p305_p6, %s1000_s11), 0  ;;  %vm406_vm0 = vcmask 130048   ;;  %vm451_vm1 = vcmask 1041408   ;;  %vm455_vm2 = vcmask 1043458  }
   0xf   : > { %420 = vmatpush.bf16.msra.mxu0 %v1023_v0  ;;  %s1021_s12 = sshll.u32 %s1458_s25, 5  ;;  %s1001_s21 = sshll.u32 %s1460_s11, 1  ;;  %vm612_vm3 = vcmask 1043456   ;;  %vm654_vm4 = vcmask 261120   ;;  %vm657_vm5 = vcmask 523264   ;;  %vm660_vm6 = vcmask 785408  }
  0x10   : > { %s1196_s15 = scalar_lea.vmem %s1439_s0, %s1021_s12  ;;  %s1464_s20 = smov (!%p342_p9, %s341_s20), 15  ;;  %vm690_vm7 = vcmask 1045504   ;;  %vm686_vm8 = vcmask 97280   ;;  %vm845_vm9 = vcmask 523520   ;;  %vm851_vm10 = vcmask 785920  }
  0x11   : > { %s311_s17 = scalar_select %p310_p7, 1, 0  ;;  %vm856_vm11 = vcmask 1048320  }
  0x12   : > { %s1200_s18 = scalar_lea.vmem %s1196_s15, %s1022_s16  ;;  %s308_s9 = scalar_lea.vmem %s1196_s15, %s1001_s21 }
  0x13   : > { %s312_s19 = scvt.s32.f32 %s311_s17  ;;  %v333_v1 = vld [vmem:[%s1200_s18] sm:$0x3]  ;;  %v334_v2 = vld [vmem:[%s1200_s18 + $0x2] sm:$0x3]  ;;  %v335_v3 = vld [vmem:[%s1200_s18 + $0x4] sm:$0x3] }
  0x14   : > { %374 = vst [vmem:[#allocation1 + $0x1] ss:$4 sm:$0xff] %v333_v1  ;;  %v336_v4 = vld [vmem:[%s1200_s18 + $0x6] sm:$0x3]  ;;  %v337_v5 = vld [vmem:[%s1200_s18 + $0x8] sm:$0x3] }
  0x15   : > { %s315_s22 = sshrl.u32 %s312_s19, 16  ;;  %377 = vst [vmem:[#allocation1 + $0x2] ss:$4 sm:$0xff] %v334_v2  ;;  %p314_p8 = scmp.ne.f32.partialorder %s312_s19, %s312_s19  ;;  %v338_v6 = vld [vmem:[%s1200_s18 + $0xa] sm:$0x3] }
  0x16   : > { %s316_s23 = sand.u32 1, %s315_s22  ;;  %380 = vst [vmem:[#allocation1 + $0x3] ss:$4 sm:$0xff] %v335_v3  ;;  %v339_v7 = vld [vmem:[%s1200_s18 + $0xc] sm:$0x3]  ;;  %s1003_s21 = sshll.u32 %s1464_s20, 1 }
  0x17   : > { %s317_s8 = sadd.s32 32767, %s316_s23  ;;  %383 = vst [vmem:[#allocation1 + $0x20] ss:$4 sm:$0xff] %v336_v4  ;;  %v309_v8 = vld [vmem:[%s308_s9] sm:$0x3]  ;;  %s1111_s20 = smov 32  }
  0x18   : > { %s318_s12 = sadd.s32 %s317_s8, %s312_s19  ;;  %386 = vst [vmem:[#allocation1 + $0x21] ss:$4 sm:$0xff] %v337_v5  ;;  %v327_v9 = vunpack.c.l.bf16 %v309_v8  ;;  %s345_s8 = scalar_lea.vmem %s1196_s15, %s1003_s21  ;;  %v340_v15 = vld [vmem:[%s1200_s18 + $0xe] sm:$0x3] }
  0x19   : > { %s319_s13 = sand.u32 4294901760, %s318_s12  ;;  %389 = vst [vmem:[#allocation1 + $0x22] ss:$4 sm:$0xff] %v338_v6  ;;  %v346_v14 = vld [vmem:[%s345_s8] sm:$0x3]  ;;  %s1109_s15 = smov 96  }
  0x1a   : > { %s1462_s13 = smov (%p314_p8, %s319_s13), 2143289344  ;;  %392 = vst [vmem:[#allocation1 + $0x23] ss:$4 sm:$0xff] %v339_v7  ;;  %v364_v16 = vunpack.c.l.bf16 %v346_v14  ;;  %s1110_s18 = smov 64  }
  0x1b   : > { %s322_s10 = sshrl.u32 %s1462_s13, 16 }
  0x1c   : > { %s323_s11 = sshll.u32 %s322_s10, 16 }
  0x1d   : > { %s324_s14 = sor.u32 %s323_s11, %s322_s10 }
  0x1e   : > { %v325_v10 = vstv %s324_s14  ;;  %s348_s16 = scalar_select %p347_p10, 1, 0 }
  0x1f   : > { %v328_v11 = vunpack.c.l.bf16 %v325_v10 }
  0x20   : > { %s349_s17 = scvt.s32.f32 %s348_s16 }
  0x21   : > { %v329_v12 = vmul.f32 %v328_v11, %v327_v9  ;;  %v394_v22 = vld.sshfl [vmem:[#allocation1 + $0x20] sm:$0xff pattern:$0x73625140] }
  0x22   : > { %s352_s22 = sshrl.u32 %s349_s17, 16  ;;  %p351_p11 = scmp.ne.f32.partialorder %s349_s17, %s349_s17 }
  0x23   : > { %v330_v13 = vpack.c.bf16 %v329_v12, %v329_v12  ;;  %s353_s19 = sand.u32 1, %s352_s22 }
  0x24   : > { %s354_s23 = sadd.s32 32767, %s353_s19 }
  0x25   : > { %371 = vst [vmem:[#allocation1] ss:$4 sm:$0xff] %v330_v13  ;;  %s355_s9 = sadd.s32 %s354_s23, %s349_s17 }
  0x26   : > { %s356_s12 = sand.u32 4294901760, %s355_s9 }
  0x27   : > { %s1466_s12 = smov (%p351_p11, %s356_s12), 2143289344 }
  0x28   : > { %s359_s13 = sshrl.u32 %s1466_s12, 16 }
  0x29   : > { %s360_s10 = sshll.u32 %s359_s13, 16 }
  0x2a   : > { %s361_s11 = sor.u32 %s360_s10, %s359_s13  ;;  %s996_s13 = sshll.u32 %s1091_s24, 2 }
  0x2b   : > { %v362_v18 = vstv %s361_s11  ;;  %p295_p12 = scmp.lt.s32.totalorder %s996_s13, 7  ;;  %s997_s10 = sshll.u32 %s1458_s25, 3 }
  0x2c   : > { %v393_v17 = vld.sshfl [vmem:[#allocation1] sm:$0xff pattern:$0x73625140]  ;;  %v365_v19 = vunpack.c.l.bf16 %v362_v18 }
  0x2d   : > { %1008 = vmatmul.msk.bf16.vlgmr.msra.gmra.mxu0 %vm406_vm0, %v393_v17  ;;  %396 = vst [vmem:[#allocation1] ss:$4 sm:$0xff] %v340_v15  ;;  %s1468_s13 = smov (!%p295_p12, %s996_s13), 7 }
  0x2e   : > { %v366_v20 = vmul.f32 %v365_v19, %v364_v16  ;;  %s298_s11 = sadd.s32 %s997_s10, %s1468_s13 }
  0x2f   : > { %s998_s14 = sshll.u32 %s298_s11, 3 }
  0x30   : > { %v367_v21 = vpack.c.bf16 %v366_v20, %v366_v20  ;;  %s1378_s21 = scalar_lea.vmem %s1446_s7, %s998_s14 }
  0x32   : > { %398 = vst [vmem:[#allocation1 + $0x1] ss:$4 sm:$0xff] %v367_v21 }
  0x39   : > { %v399_v23 = vld.sshfl [vmem:[#allocation1] sm:$0xff pattern:$0x73625140] }
  0x3d   : > { %1009 = vmatmul.msk.bf16.gmra.mxu0 %vm406_vm0, %v394_v22 }
  0x4d   : > { %1010 = vmatmul.msk.bf16.gmra.mxu0 %vm406_vm0, %v399_v23 }
  0xaa   : > { %v422_v24 = vpop.f32.mrf.mxu0 }
  0xab   : > { %v436_v25 = vpack.c.bf16 %v422_v24, %v422_v24 }
  0xad   : > { %v446_v26 = vrot.slane %v436_v25, 2 }
  0xaf   : > { %v1218_v27 = vsel %vm451_vm1, %v436_v25, %v446_v26  ;;  %v456_v28 = vsel %vm455_vm2, %v436_v25, %v446_v26 }
  0xb0   : > { %v1221_v29 = vrot.slane %v456_v28, 2  ;;  %484 = vst [vmem:[#allocation1 + $0x1] ss:$4 sm:$0xff] %v1218_v27 }
  0xb2   : > { %489 = vst [vmem:[#allocation1 + $0x21] ss:$4 sm:$0xff] %v1221_v29  ;;  %v424_v30 = vpop.f32.mrf.mxu0 }
  0xb3   : > { %v437_v31 = vpack.c.bf16 %v424_v30, %v424_v30 }
  0xb5   : > { %v447_v32 = vrot.slane %v437_v31, 2 }
  0xb7   : > { %v1226_v33 = vsel %vm451_vm1, %v437_v31, %v447_v32  ;;  %v462_v34 = vsel %vm455_vm2, %v437_v31, %v447_v32  ;;  %v1229_v35 = vld.sshfl [vmem:[#allocation1] sm:$0xff pattern:$0x73625140] }
  0xb8   : > { %v1231_v36 = vrot.slane %v462_v34, 2  ;;  %492 = vst [vmem:[#allocation1 + $0x1] ss:$4 sm:$0xff] %v1226_v33 }
  0xb9   : > { %v490_v37 = vld.sshfl [vmem:[#allocation1 + $0x20] sm:$0xff pattern:$0x73625140] }
  0xba   : > { %496 = vst [vmem:[#allocation1 + $0x21] ss:$4 sm:$0xff] %v1231_v36  ;;  %522 = vrot.lane.b32.xlu2 %v490_v37, %s1109_s15  ;;  %v427_v38 = vpop.f32.mrf.mxu0 }
  0xbb   : > { %v438_v39 = vpack.c.bf16 %v427_v38, %v427_v38 }
  0xbd   : > { %v448_v40 = vrot.slane %v438_v39, 2 }
  0xbf   : > { %v1237_v41 = vsel %vm451_vm1, %v438_v39, %v448_v40  ;;  %v468_v42 = vsel %vm455_vm2, %v438_v39, %v448_v40  ;;  %v493_v43 = vld.sshfl [vmem:[#allocation1] sm:$0xff pattern:$0x73625140] }
  0xc0   : > { %v1240_v44 = vrot.slane %v468_v42, 2  ;;  %499 = vst [vmem:[#allocation1 + $0x1] ss:$4 sm:$0xff] %v1237_v41  ;;  %524 = vrot.lane.b32.xlu0 %v493_v43, %s1109_s15 }
  0xc1   : > { %v497_v45 = vld.sshfl [vmem:[#allocation1 + $0x20] sm:$0xff pattern:$0x73625140] }
  0xc2   : > { %503 = vst [vmem:[#allocation1 + $0x21] ss:$4 sm:$0xff] %v1240_v44  ;;  %v429_v46 = vpop.f32.mrf.mxu0 }
  0xc3   : > { %v439_v47 = vpack.c.bf16 %v429_v46, %v429_v46 }
  0xc5   : > { %v449_v48 = vrot.slane %v439_v47, 2 }
  0xc7   : > { %v1246_v49 = vsel %vm451_vm1, %v439_v47, %v449_v48  ;;  %v474_v50 = vsel %vm455_vm2, %v439_v47, %v449_v48  ;;  %v500_v51 = vld.sshfl [vmem:[#allocation1] sm:$0xff pattern:$0x73625140] }
  0xc8   : > { %v1249_v52 = vrot.slane %v474_v50, 2  ;;  %506 = vst [vmem:[#allocation1 + $0x1] ss:$4 sm:$0xff] %v1246_v49 }
  0xc9   : > { %v504_v53 = vld.sshfl [vmem:[#allocation1 + $0x20] sm:$0xff pattern:$0x73625140] }
  0xca   : > { %510 = vst [vmem:[#allocation1 + $0x21] ss:$4 sm:$0xff] %v1249_v52  ;;  %530 = vrot.lane.b32.xlu0 %v504_v53, %s1109_s15  ;;  %v432_v54 = vpop.f32.mrf.mxu0 }
  0xcb   : > { %v440_v55 = vpack.c.bf16 %v432_v54, %v432_v54 }
  0xcd   : > { %v450_v56 = vrot.slane %v440_v55, 2 }
  0xcf   : > { %v1255_v57 = vsel %vm451_vm1, %v440_v55, %v450_v56  ;;  %v480_v58 = vsel %vm455_vm2, %v440_v55, %v450_v56  ;;  %v507_v59 = vld.sshfl [vmem:[#allocation1] sm:$0xff pattern:$0x73625140] }
  0xd0   : > { %v1258_v60 = vrot.slane %v480_v58, 2  ;;  %513 = vst [vmem:[#allocation1 + $0x1] ss:$4 sm:$0xff] %v1255_v57 }
  0xd1   : > { %v511_v61 = vld.sshfl [vmem:[#allocation1 + $0x20] sm:$0xff pattern:$0x73625140] }
  0xd2   : > { %534 = vrot.lane.b32.xlu1 %v511_v61, %s1109_s15  ;;  %517 = vst [vmem:[#allocation1 + $0x21] ss:$4 sm:$0xff] %v1258_v60  ;;  %532 = vrot.lane.b32.xlu0 %v507_v59, %s1109_s15  ;;  %v434_v62 = vpop.f32.mrf.mxu0 }
  0xd7   : > { %v514_v63 = vld.sshfl [vmem:[#allocation1] sm:$0xff pattern:$0x73625140] }
  0xd8   : > { %541 = vst [vmem:[#allocation1 + $0x2] ss:$4 sm:$0xff] %v1218_v27 }
  0xd9   : > { %v518_v0 = vld.sshfl [vmem:[#allocation1 + $0x20] sm:$0xff pattern:$0x73625140] }
  0xda   : > { %538 = vrot.lane.b32.xlu2 %v518_v0, %s1109_s15  ;;  %545 = vst [vmem:[#allocation1 + $0x22] ss:$4 sm:$0xff] %v1221_v29 }
  0xdf   : > { %v542_v1 = vld.sshfl [vmem:[#allocation1] sm:$0xff pattern:$0x73625140] }
  0xe0   : > { %548 = vst [vmem:[#allocation1 + $0x2] ss:$4 sm:$0xff] %v1226_v33 }
  0xe1   : > { %v546_v2 = vld.sshfl [vmem:[#allocation1 + $0x20] sm:$0xff pattern:$0x73625140] }
  0xe2   : > { %574 = vrot.lane.b32.xlu1 %v546_v2, %s1110_s18  ;;  %551 = vst [vmem:[#allocation1 + $0x22] ss:$4 sm:$0xff] %v1231_v36  ;;  %v672_v2 = vld [vmem:[%s1441_s2] sm:$0xf] }
  0xe7   : > { %v549_v3 = vld.sshfl [vmem:[#allocation1] sm:$0xff pattern:$0x73625140] }
  0xe8   : > { %554 = vst [vmem:[#allocation1 + $0x2] ss:$4 sm:$0xff] %v1237_v41 }
  0xe9   : > { %v552_v4 = vld.sshfl [vmem:[#allocation1 + $0x20] sm:$0xff pattern:$0x73625140] }
  0xea   : > { %557 = vst [vmem:[#allocation1 + $0x22] ss:$4 sm:$0xff] %v1240_v44 }
  0xef   : > { %v555_v5 = vld.sshfl [vmem:[#allocation1] sm:$0xff pattern:$0x73625140] }
  0xf0   : > { %560 = vst [vmem:[#allocation1 + $0x2] ss:$4 sm:$0xff] %v1246_v49 }
  0xf1   : > { %v558_v6 = vld.sshfl [vmem:[#allocation1 + $0x20] sm:$0xff pattern:$0x73625140] }
  0xf2   : > { %582 = vrot.lane.b32.xlu1 %v558_v6, %s1110_s18  ;;  %563 = vst [vmem:[#allocation1 + $0x22] ss:$4 sm:$0xff] %v1249_v52 }
  0xf7   : > { %v561_v7 = vld.sshfl [vmem:[#allocation1] sm:$0xff pattern:$0x73625140] }
  0xf8   : > { %584 = vrot.lane.b32.xlu2 %v561_v7, %s1110_s18  ;;  %566 = vst [vmem:[#allocation1 + $0x2] ss:$4 sm:$0xff] %v1255_v57 }
  0xf9   : > { %v564_v8 = vld.sshfl [vmem:[#allocation1 + $0x20] sm:$0xff pattern:$0x73625140] }
  0xfa   : > { %586 = vrot.lane.b32.xlu0 %v564_v8, %s1110_s18  ;;  %569 = vst [vmem:[#allocation1 + $0x22] ss:$4 sm:$0xff] %v1258_v60 }
  0xff   : > { %v567_v10 = vld.sshfl [vmem:[#allocation1] sm:$0xff pattern:$0x73625140] }
 0x100   : > { %526 = vrot.lane.b32.xlu2 %v497_v45, %s1109_s15 }
 0x101   : > { %v570_v9 = vld.sshfl [vmem:[#allocation1 + $0x20] sm:$0xff pattern:$0x73625140] }
 0x102   : > { %590 = vrot.lane.b32.xlu1 %v570_v9, %s1110_s18  ;;  %576 = vrot.lane.b32.xlu0 %v549_v3, %s1110_s18  ;;  %v671_v3 = vld [vmem:[%s1445_s6] sm:$0xff] }
 0x108   : > { %528 = vrot.lane.b32.xlu2 %v500_v51, %s1109_s15 }
 0x10a   : > { %578 = vrot.lane.b32.xlu1 %v552_v4, %s1110_s18  ;;  %580 = vrot.lane.b32.xlu0 %v555_v5, %s1110_s18  ;;  %v1112_v4 = vmov 0  }
 0x10b   : > { %1068 = vset.pattern.permute.xlu0 %v1112_v4 }
 0x110   : > { %572 = vrot.lane.b32.xlu2 %v542_v1, %s1110_s18 }
 0x112   : > { %536 = vrot.lane.b32.xlu1 %v514_v63, %s1109_s15  ;;  %588 = vrot.lane.b32.xlu0 %v567_v10, %s1110_s18  ;;  %v673_v10 = vld [vmem:[%s1442_s3] sm:$0xf] }
 0x114   : > { %v523_v12 = vpop.permute.xlu2 %522 }
 0x115   : > { %v595_v38 = vsel %vm451_vm1, %v1221_v29, %v523_v12 }
 0x11a   : > { %520 = vrot.lane.b32.xlu1 %v1229_v35, %s1109_s15 }
 0x132   : > { %v525_v11 = vpop.permute.xlu0 %524 }
 0x133   : > { %v597_v28 = vsel %vm451_vm1, %v1226_v33, %v525_v11 }
 0x134   : > { %v539_v14 = vpop.permute.xlu2 %538 }
 0x135   : > { %v611_v30 = vsel %vm451_vm1, %v1258_v60, %v539_v14 }
 0x13c   : > { %v531_v13 = vpop.permute.xlu0 %530 }
 0x13d   : > { %v603_v21 = vsel %vm451_vm1, %v1240_v44, %v531_v13 }
 0x144   : > { %v533_v15 = vpop.permute.xlu0 %532  ;;  %v535_v19 = vpop.permute.xlu1 %534 }
 0x145   : > { %v605_v16 = vsel %vm451_vm1, %v1246_v49, %v533_v15  ;;  %v607_v24 = vsel %vm451_vm1, %v1249_v52, %v535_v19 }
 0x152   : > { %v585_v17 = vpop.permute.xlu2 %584 }
 0x153   : > { %v626_v18 = vsel %vm612_vm3, %v605_v16, %v585_v17 }
 0x154   : > { %646 = vrot.lane.b32.xlu1 %v626_v18, %s1110_s18  ;;  %v575_v20 = vpop.permute.xlu1 %574 }
 0x155   : > { %v616_v42 = vsel %vm612_vm3, %v595_v38, %v575_v20 }
 0x15a   : > { %v527_v37 = vpop.permute.xlu2 %526 }
 0x15b   : > { %v599_v33 = vsel %vm451_vm1, %v1231_v36, %v527_v37 }
 0x162   : > { %v529_v43 = vpop.permute.xlu2 %528 }
 0x163   : > { %v601_v29 = vsel %vm451_vm1, %v1237_v41, %v529_v43 }
 0x164   : > { %v583_v22 = vpop.permute.xlu1 %582 }
 0x165   : > { %v624_v23 = vsel %vm612_vm3, %v603_v21, %v583_v22  ;;  %v764_v21 = vld [vmem:[%s1444_s5] sm:$0xf] }
 0x166   : > { %643 = vrot.lane.b32.xlu2 %v624_v23, %s1111_s20  ;;  %v763_v22 = vld [vmem:[%s1443_s4] sm:$0xf] }
 0x16a   : > { %v573_v45 = vpop.permute.xlu2 %572 }
 0x16c   : > { %v587_v25 = vpop.permute.xlu0 %586 }
 0x16d   : > { %v628_v26 = vsel %vm612_vm3, %v607_v24, %v587_v25 }
 0x16e   : > { %649 = vrot.lane.b32.xlu2 %v628_v26, %s1109_s15 }
 0x174   : > { %v591_v31 = vpop.permute.xlu1 %590  ;;  %v577_v32 = vpop.permute.xlu0 %576 }
 0x175   : > { %v618_v34 = vsel %vm612_vm3, %v597_v28, %v577_v32  ;;  %v632_v35 = vsel %vm612_vm3, %v611_v30, %v591_v31 }
 0x176   : > { %637 = vrot.lane.b32.xlu1 %v618_v34, %s1110_s18  ;;  %652 = vrot.lane.b32.xlu0 %v632_v35, %s1111_s20 }
 0x17c   : > { %v579_v39 = vpop.permute.xlu1 %578  ;;  %v581_v48 = vpop.permute.xlu0 %580 }
 0x17d   : > { %v620_v40 = vsel %vm612_vm3, %v599_v33, %v579_v39  ;;  %v622_v36 = vsel %vm612_vm3, %v601_v29, %v581_v48 }
 0x17e   : > { %640 = vrot.lane.b32.xlu2 %v620_v40, %s1109_s15  ;;  %634 = vrot.lane.b32.xlu0 %v616_v42, %s1111_s20 }
 0x184   : > { %v537_v44 = vpop.permute.xlu1 %536  ;;  %v589_v54 = vpop.permute.xlu0 %588 }
 0x185   : > { %v609_v55 = vsel %vm451_vm1, %v1255_v57, %v537_v44 }
 0x186   : > { %v630_v41 = vsel %vm612_vm3, %v609_v55, %v589_v54 }
 0x18c   : > { %v521_v46 = vpop.permute.xlu1 %520 }
 0x18d   : > { %v593_v59 = vsel %vm451_vm1, %v1218_v27, %v521_v46 }
 0x18e   : > { %v614_v60 = vsel %vm612_vm3, %v593_v59, %v573_v45 }
 0x1c0   : > { %v644_v47 = vpop.permute.xlu2 %643 }
 0x1c1   : > { %v664_v49 = vsel %vm654_vm4, %v622_v36, %v644_v47 }
 0x1c6   : > { %v647_v50 = vpop.permute.xlu1 %646 }
 0x1c7   : > { %v666_v51 = vsel %vm657_vm5, %v664_v49, %v647_v50 }
 0x1c8   : > { %v650_v52 = vpop.permute.xlu2 %649 }
 0x1c9   : > { %v668_v53 = vsel %vm660_vm6, %v666_v51, %v650_v52 }
 0x1ca   : > { %679 = vrot.lane.b32.xlu0 %v668_v53, %s1109_s15  ;;  %v728_v9 = vsel %vm690_vm7, %v668_v53, 0 }
 0x1d8   : > { %v641_v0 = vpop.permute.xlu2 %640 }
 0x1e8   : > { %v653_v56 = vpop.permute.xlu0 %652  ;;  %v638_v62 = vpop.permute.xlu1 %637 }
 0x1e9   : > { %v670_v58 = vsel %vm654_vm4, %v630_v41, %v653_v56 }
 0x1ea   : > { %681 = vrot.lane.b32.xlu1 %v670_v58, %s1109_s15 }
 0x1f0   : > { %v635_v61 = vpop.permute.xlu0 %634 }
 0x1f1   : > { %v656_v63 = vsel %vm654_vm4, %v614_v60, %v635_v61 }
 0x1f2   : > { %767 = vrot.lane.b32.xlu1 %v668_v53, %s1110_s18  ;;  %v659_v57 = vsel %vm657_vm5, %v656_v63, %v638_v62 }
 0x1f3   : > { %v662_v1 = vsel %vm660_vm6, %v659_v57, %v641_v0 }
 0x1f4   : > { %765 = vrot.lane.b32.xlu0 %v662_v1, %s1110_s18  ;;  %677 = vrot.lane.b32.xlu2 %v662_v1, %s1109_s15  ;;  %v726_v27 = vsel %vm690_vm7, %v662_v1, 0 }
 0x1f5   : > { %737 = vmatpush.bf16.msra.mxu3 %v726_v27 }
 0x1f8   : > { %1013 = vmatmul.msk.bf16.vlgmr.msra.gmra.mxu3 %vm686_vm8, %v672_v2 }
 0x1fc   : > { %769 = vrot.lane.b32.xlu2 %v670_v58, %s1110_s18  ;;  %758 = vperm.xlu0 %1068, %v671_v3  }
 0x23c   : > { %v680_v5 = vpop.permute.xlu0 %679 }
 0x24e   : > { %v678_v6 = vpop.permute.xlu2 %677 }
 0x24f   : > { %v684_v7 = vsel %vm660_vm6, %v678_v6, %v680_v5 }
 0x250   : > { %v692_v8 = vsel %vm690_vm7, %v684_v7, 0 }
 0x251   : > { %704 = vmatpush.bf16.msra.mxu1 %v692_v8 }
 0x254   : > { %1011 = vmatmul.msk.bf16.vlgmr.msra.gmra.mxu1 %vm686_vm8, %v673_v10 }
 0x255   : > { %750 = vmatpush.bf16.msrb.mxu1 %v728_v9 }
 0x256   : > { %v770_v14 = vpop.permute.xlu2 %769 }
 0x259   : > { %819 = vmatpush.bf16.msra.mxu1 %v692_v8 }
 0x25c   : > { %v682_v11 = vpop.permute.xlu1 %681 }
 0x25d   : > { %v685_v12 = vsel %vm660_vm6, %v680_v5, %v682_v11 }
 0x25e   : > { %v695_v13 = vsel %vm690_vm7, %v685_v12, 0 }
 0x25f   : > { %717 = vmatpush.bf16.msra.mxu2 %v695_v13 }
 0x262   : > { %1012 = vmatmul.msk.bf16.vlgmr.msra.gmra.mxu2 %vm686_vm8, %v673_v10 }
 0x264   : > { %v768_v15 = vpop.permute.xlu1 %767  ;;  %1014 = vmatmul.msk.bf16.vlgmr.msrb.gmra.mxu1 %vm686_vm8, %v672_v2 }
 0x265   : > { %v773_v16 = vsel %vm657_vm5, %v768_v15, %v770_v14 }
 0x266   : > { %v766_v17 = vpop.permute.xlu0 %765  ;;  %v781_v18 = vsel %vm690_vm7, %v773_v16, 0 }
 0x267   : > { %803 = vmatpush.bf16.msrb.mxu3 %v781_v18  ;;  %v772_v19 = vsel %vm657_vm5, %v766_v17, %v768_v15 }
 0x268   : > { %v778_v20 = vsel %vm690_vm7, %v772_v19, 0 }
 0x269   : > { %790 = vmatpush.bf16.msrb.mxu2 %v778_v20 }
 0x26a   : > { %1016 = vmatmul.msk.bf16.vlgmr.msrb.gmra.mxu3 %vm686_vm8, %v764_v21 }
 0x26d   : > { %832 = vmatpush.bf16.msra.mxu2 %v695_v13 }
 0x26e   : > { %v759_v26 = vpop.permute.xlu0 %758 }
 0x272   : > { %1015 = vmatmul.msk.bf16.vlgmr.msrb.gmra.mxu2 %vm686_vm8, %v764_v21 }
 0x274   : > { %1017 = vmatmul.msk.bf16.vlgmr.msra.gmra.mxu1 %vm686_vm8, %v763_v22 }
 0x27b   : > { %v739_v23 = vpop.f32.mrf.mxu3 }
 0x282   : > { %1018 = vmatmul.msk.bf16.vlgmr.msra.gmra.mxu2 %vm686_vm8, %v763_v22 }
 0x283   : > { %v741_v24 = vpop.f32.mrf.mxu3 }
 0x2d1   : > { %v706_v25 = vpop.f32.mrf.mxu1 }
 0x2d2   : > { %v740_v28 = vadd.f32 %v739_v23, %v706_v25 }
 0x2d4   : > { %v761_v30 = vadd.f32 %v759_v26, %v740_v28 }
 0x2d6   : > { %858 = vrot.lane.b32.xlu1 %v761_v30, %s1110_s18  ;;  %866 = vrot.lane.b32.xlu0 %v761_v30, %s1109_s15  ;;  %840 = vst.msk [vmem:[%s1378_s21] sm:$0xff] %vm654_vm4, %v761_v30 }
 0x2d7   : > { %848 = vrot.lane.b32.xlu2 %v761_v30, %s1111_s20 }
 0x2d9   : > { %v708_v31 = vpop.f32.mrf.mxu1 }
 0x2e1   : > { %v752_v32 = vpop.f32.mrf.mxu1 }
 0x2e5   : > { %v719_v34 = vpop.f32.mrf.mxu2 }
 0x2e6   : > { %v753_v35 = vadd.f32 %v752_v32, %v719_v34 }
 0x2e8   : > { %v762_v37 = vadd.f32 %v759_v26, %v753_v35 }
 0x2e9   : > { %v754_v38 = vpop.f32.mrf.mxu1 }
 0x2ea   : > { %886 = vrot.lane.b32.xlu2 %v762_v37, %s1110_s18  ;;  %878 = vrot.lane.b32.xlu1 %v762_v37, %s1111_s20  ;;  %871 = vst.msk [vmem:[%s1378_s21 + $0x10] sm:$0xff] %vm654_vm4, %v762_v37 }
 0x2ed   : > { %v721_v33 = vpop.f32.mrf.mxu2  ;;  %v805_v39 = vpop.f32.mrf.mxu3 }
 0x2f1   : > { %v821_v40 = vpop.f32.mrf.mxu1 }
 0x2f5   : > { %v792_v42 = vpop.f32.mrf.mxu2  ;;  %v807_v43 = vpop.f32.mrf.mxu3 }
 0x2f6   : > { %v822_v44 = vadd.f32 %v821_v40, %v792_v42 }
 0x2f8   : > { %v838_v45 = vadd.f32 %v822_v44, %v759_v26 }
 0x2f9   : > { %v823_v46 = vpop.f32.mrf.mxu1 }
 0x2fa   : > { %862 = vrot.lane.b32.xlu2 %v838_v45, %s1109_s15  ;;  %842 = vrot.lane.b32.xlu1 %v838_v45, %s1111_s20 }
 0x2fd   : > { %v794_v47 = vpop.f32.mrf.mxu2 }
 0x302   : > { %894 = vrot.lane.b32.xlu2 %v762_v37, %s1109_s15 }
 0x305   : > { %v834_v48 = vpop.f32.mrf.mxu2 }
 0x306   : > { %v835_v29 = vadd.f32 %v834_v48, %v805_v39 }
 0x308   : > { %v839_v36 = vadd.f32 %v835_v29, %v759_v26 }
 0x30a   : > { %873 = vrot.lane.b32.xlu0 %v839_v36, %s1111_s20  ;;  %890 = vrot.lane.b32.xlu1 %v839_v36, %s1109_s15 }
 0x30d   : > { %v836_v49 = vpop.f32.mrf.mxu2 }
 0x312   : > { %853 = vrot.lane.b32.xlu0 %v838_v45, %s1110_s18  ;;  %882 = vrot.lane.b32.xlu1 %v839_v36, %s1110_s18 }
 0x331   : > { %v849_v50 = vpop.permute.xlu2 %848 }
 0x344   : > { %v887_v51 = vpop.permute.xlu2 %886 }
 0x345   : > { %889 = vst.msk [vmem:[%s1378_s21 + $0x18] sm:$0xff] %vm654_vm4, %v887_v51 }
 0x348   : > { %v859_v52 = vpop.permute.xlu1 %858  ;;  %v867_v53 = vpop.permute.xlu0 %866 }
 0x349   : > { %861 = vst.msk [vmem:[%s1378_s21 + $0x8] sm:$0xff] %vm654_vm4, %v859_v52 }
 0x354   : > { %v863_v54 = vpop.permute.xlu2 %862 }
 0x355   : > { %865 = vst.msk [vmem:[%s1378_s21 + $0x8] sm:$0xff] %vm845_vm9, %v863_v54 }
 0x356   : > { %869 = vst.msk [vmem:[%s1378_s21 + $0x8] sm:$0xff] %vm851_vm10, %v867_v53 }
 0x357   : > { %870 = vst.msk [vmem:[%s1378_s21 + $0x8] sm:$0xff] %vm856_vm11, %v838_v45 }
 0x35c   : > { %v879_v55 = vpop.permute.xlu1 %878  ;;  %v895_v59 = vpop.permute.xlu2 %894 }
 0x36c   : > { %v843_v41 = vpop.permute.xlu1 %842 }
 0x36d   : > { %846 = vst.msk [vmem:[%s1378_s21] sm:$0xff] %vm845_vm9, %v843_v41 }
 0x36e   : > { %852 = vst.msk [vmem:[%s1378_s21] sm:$0xff] %vm851_vm10, %v849_v50 }
 0x37c   : > { %v874_v56 = vpop.permute.xlu0 %873  ;;  %v891_v58 = vpop.permute.xlu1 %890 }
 0x37d   : > { %876 = vst.msk [vmem:[%s1378_s21 + $0x10] sm:$0xff] %vm845_vm9, %v874_v56 }
 0x37e   : > { %881 = vst.msk [vmem:[%s1378_s21 + $0x10] sm:$0xff] %vm851_vm10, %v879_v55 }
 0x37f   : > { %893 = vst.msk [vmem:[%s1378_s21 + $0x18] sm:$0xff] %vm845_vm9, %v891_v58 }
 0x380   : > { %897 = vst.msk [vmem:[%s1378_s21 + $0x18] sm:$0xff] %vm851_vm10, %v895_v59 }
 0x381   : > { %898 = vst.msk [vmem:[%s1378_s21 + $0x18] sm:$0xff] %vm856_vm11, %v839_v36 }
 0x384   : > { %v854_v60 = vpop.permute.xlu0 %853  ;;  %v883_v61 = vpop.permute.xlu1 %882 }
 0x385   : > { %857 = vst.msk [vmem:[%s1378_s21] sm:$0xff] %vm856_vm11, %v854_v60 }
 0x386   : > { %885 = vst.msk [vmem:[%s1378_s21 + $0x10] sm:$0xff] %vm856_vm11, %v883_v61 }
 0x387 PF: > { %s17_s28 = sadd.s32 1, %s1107_s28   ;;  %s1447_s24 = smov %s1099_s26 }
 0x388   : > { %p14_p13 = scmp.ge.s32.totalorder %s17_s28, 6   ;;  %s1448_s25 = smov %s1103_s27 }
 0x389   : > { %s1449_s26 = smov %s1452_s29  ;;  %s1450_s27 = smov %s1456_s30 }
 0x38a   :  { %16 = sbr.rel (!%p14_p13) target bundleno = 3 (0x3), region = 92 }

</bundles_post_ra>
